<compile_context>
chip_gen: v7x
topology: tpu7x:2x2x1
jax: 0.10.0
libtpu: 0.0.40
codegen_flags: <defaults>
</compile_context>

<pallas_src>
import jax
import jax.numpy as jnp
import numpy as np
from jax.experimental import pallas as pl
from jax.experimental.pallas import tpu as pltpu


# Geometry implied by the PyTorch module.
H = W = 16              # input spatial size
CIN = 8                 # conv0 in-channels
COUT = 8                # conv3 out-channels
KEFF = 5                # four stacked 2x2 valid convs == one 5x5 valid conv
HO = H - (KEFF - 1)     # 12
WO = W - (KEFF - 1)     # 12
LANES = W * CIN         # 128: one image row, lane-dense
assert LANES == 128 and WO * COUT <= LANES


def _convnet_kernel(x_ref, p_ref, o_ref):
    """Composed 5x5 conv as 5 row-shifted lane-dense MXU matmuls.

    x_ref: (nrows+8, 128) f32  row n*16+i = image n, image-row i (16px*8ch);
                               last 8 rows are zero padding for the shifts.
    p_ref: (5*128+8, 128) f32  rows [d*128:(d+1)*128] = B_d (block-Toeplitz
                               operator for row offset d); row 640 = bias.
    o_ref: (nrows, 128) f32    row n*16+i, lane j*8+co (j<12 valid).
    """
    nrows = o_ref.shape[0]
    x = x_ref[...]                                        # (nrows+8, 128)
    acc = jnp.dot(x[0:nrows, :], p_ref[0:LANES, :],
                  preferred_element_type=jnp.float32)
    for d in range(1, KEFF):
        xs = x[d:d + nrows, :]                            # rows shifted by d
        w_d = p_ref[d * LANES:(d + 1) * LANES, :]         # (128,128) static view
        acc = acc + jnp.dot(xs, w_d, preferred_element_type=jnp.float32)
    o_ref[...] = acc + p_ref[KEFF * LANES:KEFF * LANES + 1, :]   # + bias row


def _pallas_convnet(x2d_padded, packed, nrows):
    return pl.pallas_call(
        _convnet_kernel,
        out_shape=jax.ShapeDtypeStruct((nrows, LANES), jnp.float32),
        grid=(1,),
        in_specs=[
            pl.BlockSpec(x2d_padded.shape, lambda i: (0, 0)),
            pl.BlockSpec(packed.shape, lambda i: (0, 0)),
        ],
        out_specs=pl.BlockSpec((nrows, LANES), lambda i: (0, 0)),
        compiler_params=pltpu.CompilerParams(
            dimension_semantics=("arbitrary",)),
    )(x2d_padded, packed)


def convnet_forward(x_nchw, packed):
    """Reproduces ConvNet.forward on one device in fp32 (NCHW in/out)."""
    n = x_nchw.shape[0]
    nrows = n * H
    x = jnp.transpose(x_nchw.astype(jnp.float32), (0, 2, 3, 1))  # NHWC
    x2d = x.reshape(nrows, LANES)                                # lane-dense rows
    x2d = jnp.concatenate(                                       # room for row shifts
        [x2d, jnp.zeros((8, LANES), jnp.float32)], axis=0)       # (nrows+8, 128)
    y2d = _pallas_convnet(x2d, packed, nrows)                    # (nrows, 128)
    y = y2d.reshape(n, H, LANES // COUT, COUT)[:, :HO, :WO, :]   # valid region
    return jnp.transpose(y, (0, 3, 1, 2))                        # NCHW


# ---------------- one-time offline composition / packing (numpy) -------------

def _np_conv2d_valid(x, w):
    """Valid cross-correlation, NCHW x OIHW -> NCHW (numpy)."""
    _, _, kh, kw = w.shape
    ho = x.shape[2] - kh + 1
    wo = x.shape[3] - kw + 1
    y = 0.0
    for di in range(kh):
        for dj in range(kw):
            y = y + np.einsum('ncij,oc->noij',
                              x[:, :, di:di + ho, dj:dj + wo], w[:, :, di, dj])
    return y


def compose_convnet(params):
    """Fold conv0..conv3 (affine, no activations) into one 5x5 conv + bias."""
    p64 = [(np.asarray(w, np.float64), np.asarray(b, np.float64)) for w, b in params]
    # Effective weights by probing with delta inputs (exact for a linear net).
    y = np.eye(CIN * KEFF * KEFF, dtype=np.float64).reshape(
        CIN * KEFF * KEFF, CIN, KEFF, KEFF)
    for w, _ in p64:
        y = _np_conv2d_valid(y, w)
    w_eff = y.reshape(CIN, KEFF, KEFF, COUT)          # [ci, kh, kw, co]
    # Effective bias: zeros input through the chain with biases.
    z = np.zeros((1, CIN, KEFF, KEFF), np.float64)
    for w, b in p64:
        z = _np_conv2d_valid(z, w) + b.reshape(1, -1, 1, 1)
    b_eff = z.reshape(COUT)
    return w_eff, b_eff


def pack_params(params):
    """Pack composed weights + bias into one lane-dense (648, 128) buffer.

    B_d[jp*8+ci, j*8+co] = W_eff[co, ci, d, jp-j]  (zero unless 0<=jp-j<5, j<12)
    Row 640 = per-lane bias, remaining rows zero.
    """
    w_eff, b_eff = compose_convnet(params)
    buf = np.zeros((KEFF * LANES + 8, LANES), np.float32)
    for d in range(KEFF):
        for dj in range(KEFF):
            blk = w_eff[:, d, dj, :].astype(np.float32)        # (ci, co)
            for j in range(WO):
                jp = j + dj
                buf[d * LANES + jp * CIN:d * LANES + (jp + 1) * CIN,
                    j * COUT:(j + 1) * COUT] = blk
    buf[KEFF * LANES, :WO * COUT] = np.tile(b_eff.astype(np.float32), WO)
    return jnp.asarray(buf)


def init_conv_params(key, cout, cin, kh=2, kw=2):
    """Deterministic init mimicking PyTorch Conv2d default (U[-1/sqrt(fan_in), ...])."""
    fan_in = cin * kh * kw
    bound = 1.0 / np.sqrt(fan_in)
    kw_key, kb_key = jax.random.split(key)
    w = jax.random.uniform(kw_key, (cout, cin, kh, kw), jnp.float32, -bound, bound)
    b = jax.random.uniform(kb_key, (cout,), jnp.float32, -bound, bound)
    return w, b


if __name__ == "__main__":
    key = jax.random.PRNGKey(0)
    k_x, k0, k1, k2, k3 = jax.random.split(key, 5)

    # Shapes implied by the module: batch=2, Cin=8, spatial 16x16.
    x = jax.random.normal(k_x, (2, CIN, H, W), jnp.float32)

    params = [
        init_conv_params(k0, 16, 8),     # conv0:  8 -> 16
        init_conv_params(k1, 32, 16),    # conv1: 16 -> 32
        init_conv_params(k2, 16, 32),    # conv2: 32 -> 16
        init_conv_params(k3, 8, 16),     # conv3: 16 ->  8
    ]
    # One-time composition + packing (hoisted out of the forward path).
    packed = pack_params(params)

    # TODO(synk): the module's per-layer .to(device=..., dtype=..., memory_format=...)
    # cross-GPU / mixed-dtype moves have no single-device Pallas equivalent; this
    # runs the whole forward on one TPU core in fp32.
    forward = jax.jit(convnet_forward)
    out = jax.block_until_ready(forward(x, packed))
    assert out.shape == (2, COUT, HO, WO), out.shape

    # float64 layer-by-layer numpy reference of the original forward.
    ref = np.asarray(x, np.float64)
    for w, b in params:
        ref = _np_conv2d_valid(ref, np.asarray(w, np.float64))
        ref = ref + np.asarray(b, np.float64).reshape(1, -1, 1, 1)
    np.testing.assert_allclose(np.asarray(out), ref, rtol=1e-4, atol=1e-4)

    print("KERNEL_OK")
</pallas_src>

<mosaic_0001>
module attributes {stable_mosaic.version = 11 : i64} {
  func.func @_convnet_kernel(%arg0: i32, %arg1: memref<40x128xf32, #tpu.memory_space<vmem>>, %arg2: memref<648x128xf32, #tpu.memory_space<vmem>>, %arg3: memref<32x128xf32, #tpu.memory_space<vmem>>) attributes {dimension_semantics = [#tpu.dimension_semantics<arbitrary>], iteration_bounds = array<i64: 1>, scalar_prefetch = 0 : i64, scratch_operands = 0 : i64, tpu.core_type = #tpu.core_type<tc>, window_params = [{pipeline_mode = #tpu.pipeline_mode<synchronous>, transform_indices = @transform_0, window_bounds = array<i64: 40, 128>}, {pipeline_mode = #tpu.pipeline_mode<synchronous>, transform_indices = @transform_1, window_bounds = array<i64: 648, 128>}, {pipeline_mode = #tpu.pipeline_mode<synchronous>, transform_indices = @transform_2, window_bounds = array<i64: 32, 128>}]} {
    %c0 = arith.constant 0 : index
    %c0_0 = arith.constant 0 : index
    %0 = vector.load %arg1[%c0, %c0_0] : memref<40x128xf32, #tpu.memory_space<vmem>>, vector<40x128xf32>
    %1 = vector.extract_strided_slice %0 {offsets = [0, 0], sizes = [32, 128], strides = [1, 1]} : vector<40x128xf32> to vector<32x128xf32>
    %c0_1 = arith.constant 0 : index
    %c0_2 = arith.constant 0 : index
    %2 = vector.load %arg2[%c0_1, %c0_2] : memref<648x128xf32, #tpu.memory_space<vmem>>, vector<128x128xf32>
    %cst = arith.constant dense<0.000000e+00> : vector<32x128xf32>
    %3 = tpu.matmul %1, %2, %cst {dimension_numbers = #tpu.dot_dimension_numbers<[1], [0], [0], [1], [0, 0, 1, 1], [], []>} : vector<32x128xf32>, vector<128x128xf32>, vector<32x128xf32> -> vector<32x128xf32>
    %4 = vector.extract_strided_slice %0 {offsets = [1, 0], sizes = [32, 128], strides = [1, 1]} : vector<40x128xf32> to vector<32x128xf32>
    %c128 = arith.constant 128 : index
    %c0_3 = arith.constant 0 : index
    %5 = vector.load %arg2[%c128, %c0_3] : memref<648x128xf32, #tpu.memory_space<vmem>>, vector<128x128xf32>
    %cst_4 = arith.constant dense<0.000000e+00> : vector<32x128xf32>
    %6 = tpu.matmul %4, %5, %cst_4 {dimension_numbers = #tpu.dot_dimension_numbers<[1], [0], [0], [1], [0, 0, 1, 1], [], []>} : vector<32x128xf32>, vector<128x128xf32>, vector<32x128xf32> -> vector<32x128xf32>
    %7 = arith.addf %3, %6 : vector<32x128xf32>
    %8 = vector.extract_strided_slice %0 {offsets = [2, 0], sizes = [32, 128], strides = [1, 1]} : vector<40x128xf32> to vector<32x128xf32>
    %c256 = arith.constant 256 : index
    %c0_5 = arith.constant 0 : index
    %9 = vector.load %arg2[%c256, %c0_5] : memref<648x128xf32, #tpu.memory_space<vmem>>, vector<128x128xf32>
    %cst_6 = arith.constant dense<0.000000e+00> : vector<32x128xf32>
    %10 = tpu.matmul %8, %9, %cst_6 {dimension_numbers = #tpu.dot_dimension_numbers<[1], [0], [0], [1], [0, 0, 1, 1], [], []>} : vector<32x128xf32>, vector<128x128xf32>, vector<32x128xf32> -> vector<32x128xf32>
    %11 = arith.addf %7, %10 : vector<32x128xf32>
    %12 = vector.extract_strided_slice %0 {offsets = [3, 0], sizes = [32, 128], strides = [1, 1]} : vector<40x128xf32> to vector<32x128xf32>
    %c384 = arith.constant 384 : index
    %c0_7 = arith.constant 0 : index
    %13 = vector.load %arg2[%c384, %c0_7] : memref<648x128xf32, #tpu.memory_space<vmem>>, vector<128x128xf32>
    %cst_8 = arith.constant dense<0.000000e+00> : vector<32x128xf32>
    %14 = tpu.matmul %12, %13, %cst_8 {dimension_numbers = #tpu.dot_dimension_numbers<[1], [0], [0], [1], [0, 0, 1, 1], [], []>} : vector<32x128xf32>, vector<128x128xf32>, vector<32x128xf32> -> vector<32x128xf32>
    %15 = arith.addf %11, %14 : vector<32x128xf32>
    %16 = vector.extract_strided_slice %0 {offsets = [4, 0], sizes = [32, 128], strides = [1, 1]} : vector<40x128xf32> to vector<32x128xf32>
    %c512 = arith.constant 512 : index
    %c0_9 = arith.constant 0 : index
    %17 = vector.load %arg2[%c512, %c0_9] : memref<648x128xf32, #tpu.memory_space<vmem>>, vector<128x128xf32>
    %cst_10 = arith.constant dense<0.000000e+00> : vector<32x128xf32>
    %18 = tpu.matmul %16, %17, %cst_10 {dimension_numbers = #tpu.dot_dimension_numbers<[1], [0], [0], [1], [0, 0, 1, 1], [], []>} : vector<32x128xf32>, vector<128x128xf32>, vector<32x128xf32> -> vector<32x128xf32>
    %19 = arith.addf %15, %18 : vector<32x128xf32>
    %c640 = arith.constant 640 : index
    %c0_11 = arith.constant 0 : index
    %20 = vector.load %arg2[%c640, %c0_11] : memref<648x128xf32, #tpu.memory_space<vmem>>, vector<1x128xf32>
    %21 = vector.broadcast %20 : vector<1x128xf32> to vector<32x128xf32>
    %22 = arith.addf %19, %21 : vector<32x128xf32>
    %c0_12 = arith.constant 0 : index
    %c0_13 = arith.constant 0 : index
    %23 = vector.load %arg3[%c0_12, %c0_13] : memref<32x128xf32, #tpu.memory_space<vmem>>, vector<32x128xf32>
    tpu.vector_store %arg3[%c0_12, %c0_13], %22 {strides = array<i32>} : memref<32x128xf32, #tpu.memory_space<vmem>>, vector<32x128xf32>,
    return
  }
  func.func @transform_0(%arg0: i32) -> (i32, i32) {
    %c0_i32 = arith.constant 0 : i32
    %c0_i32_0 = arith.constant 0 : i32
    %c0_i32_1 = arith.constant 0 : i32
    return %c0_i32, %c0_i32_0 : i32, i32
  }
  func.func @transform_1(%arg0: i32) -> (i32, i32) {
    %c0_i32 = arith.constant 0 : i32
    %c0_i32_0 = arith.constant 0 : i32
    %c0_i32_1 = arith.constant 0 : i32
    return %c0_i32, %c0_i32_0 : i32, i32
  }
  func.func @transform_2(%arg0: i32) -> (i32, i32) {
    %c0_i32 = arith.constant 0 : i32
    %c0_i32_0 = arith.constant 0 : i32
    %c0_i32_1 = arith.constant 0 : i32
    return %c0_i32, %c0_i32_0 : i32, i32
  }
}

</mosaic_0001>

<bundles_post_ra>
// kernel: convnet_forward.1
= control target key start
LH: loop header
LB: loop body
LE: loop exit
PB: predicated region body
PF: predicated region fallthrough
CT: control target
= control target key end

     0   :  { %vm53_vm0 = vcmask 1046528   ;;  %vm253_vm1 = vcmask 1045504   ;;  %vm372_vm2 = vcmask 1044480   ;;  %vm491_vm3 = vcmask 1043456   ;;  %s1445_s1 = inlined_call_operand.vmem [shape: f32[648,128], index: 1, kind: input, shape index: {}]   ;;  %s1446_s0 = inlined_call_operand.vmem [shape: f32[40,128], index: 0, kind: input, shape index: {}]   ;;  %s1447_s2 = inlined_call_operand.vmem [shape: f32[32,128], index: 2, kind: output, shape index: {}]  }
   0x1   :  { %v32_v0 = vld [vmem:[%s1445_s1 + $0x80] sm:$0xff]  ;;  %v33_v1 = vld [vmem:[%s1445_s1 + $0x88] sm:$0xff]  ;;  %v34_v5 = vld [vmem:[%s1445_s1 + $0x90] sm:$0xff] }
   0x2   :  { %v237_v2 = vld [vmem:[%s1445_s1 + $0x100] sm:$0xff]  ;;  %v902_v3 = vpack.c.bf16 %v33_v1, %v32_v0  ;;  %v238_v4 = vld [vmem:[%s1445_s1 + $0x108] sm:$0xff]  ;;  %v35_v6 = vld [vmem:[%s1445_s1 + $0x98] sm:$0xff] }
   0x3   :  { %v966_v7 = vpack.c.bf16 %v238_v4, %v237_v2  ;;  %v906_v8 = vpack.c.bf16 %v35_v6, %v34_v5  ;;  %v239_v9 = vld [vmem:[%s1445_s1 + $0x110] sm:$0xff]  ;;  %v240_v10 = vld [vmem:[%s1445_s1 + $0x118] sm:$0xff]  ;;  %v36_v11 = vld [vmem:[%s1445_s1 + $0xa0] sm:$0xff] }
   0x4   :  { %903 = vmatprep.subr.bf16.mxu1 %v902_v3  ;;  %v970_v12 = vpack.c.bf16 %v240_v10, %v239_v9  ;;  %v37_v13 = vld [vmem:[%s1445_s1 + $0xa8] sm:$0xff]  ;;  %v241_v14 = vld [vmem:[%s1445_s1 + $0x120] sm:$0xff]  ;;  %v38_v18 = vld [vmem:[%s1445_s1 + $0xb0] sm:$0xff] }
   0x5   :  { %v242_v15 = vld [vmem:[%s1445_s1 + $0x128] sm:$0xff]  ;;  %967 = vmatprep.subr.bf16.mxu0 %v966_v7  ;;  %905 = vmatpush3.bf16.msra.mxu1 %v902_v3  ;;  %v910_v16 = vpack.c.bf16 %v37_v13, %v36_v11  ;;  %v39_v19 = vld [vmem:[%s1445_s1 + $0xb8] sm:$0xff]  ;;  %v243_v20 = vld [vmem:[%s1445_s1 + $0x130] sm:$0xff] }
   0x6   :  { %969 = vmatpush3.bf16.msra.mxu0 %v966_v7  ;;  %907 = vmatprep.subr.bf16.mxu1 %v906_v8  ;;  %v974_v17 = vpack.c.bf16 %v242_v15, %v241_v14  ;;  %v244_v21 = vld [vmem:[%s1445_s1 + $0x138] sm:$0xff]  ;;  %v914_v22 = vpack.c.bf16 %v39_v19, %v38_v18  ;;  %v40_v24 = vld [vmem:[%s1445_s1 + $0xc0] sm:$0xff]  ;;  %v41_v25 = vld [vmem:[%s1445_s1 + $0xc8] sm:$0xff] }
   0x7   :  { %971 = vmatprep.subr.bf16.mxu0 %v970_v12  ;;  %v978_v23 = vpack.c.bf16 %v244_v21, %v243_v20  ;;  %v1166_v26 = vld [vmem:[%s1446_s0] sm:$0xff]  ;;  %v246_v28 = vld [vmem:[%s1445_s1 + $0x148] sm:$0xff]  ;;  %v918_v34 = vpack.c.bf16 %v41_v25, %v40_v24  ;;  %v42_v36 = vld [vmem:[%s1445_s1 + $0xd0] sm:$0xff] }
   0x8   :  { %v245_v27 = vld [vmem:[%s1445_s1 + $0x140] sm:$0xff]  ;;  %v1177_v29 = vld [vmem:[%s1446_s0 + $0x8] sm:$0xff]  ;;  %v54_v30 = vrot.slane %v1166_v26, 1  ;;  %v254_v31 = vrot.slane %v1166_v26, 2  ;;  %v43_v37 = vld [vmem:[%s1445_s1 + $0xd8] sm:$0xff] }
   0x9   :  { %909 = vmatpush3.bf16.msra.mxu1 %v906_v8  ;;  %v55_v32 = vrot.slane %v1177_v29, 1  ;;  %v255_v33 = vrot.slane %v1177_v29, 2  ;;  %v982_v35 = vpack.c.bf16 %v246_v28, %v245_v27  ;;  %v247_v40 = vld [vmem:[%s1445_s1 + $0x150] sm:$0xff]  ;;  %v248_v41 = vld [vmem:[%s1445_s1 + $0x158] sm:$0xff]  ;;  %v922_v42 = vpack.c.bf16 %v43_v37, %v42_v36  ;;  %v44_v44 = vld [vmem:[%s1445_s1 + $0xe0] sm:$0xff] }
   0xa   :  { %973 = vmatpush3.bf16.msra.mxu0 %v970_v12  ;;  %911 = vmatprep.subr.bf16.mxu1 %v910_v16  ;;  %v986_v43 = vpack.c.bf16 %v248_v41, %v247_v40  ;;  %v45_v45 = vld [vmem:[%s1445_s1 + $0xe8] sm:$0xff]  ;;  %v249_v46 = vld [vmem:[%s1445_s1 + $0x160] sm:$0xff]  ;;  %v46_v50 = vld [vmem:[%s1445_s1 + $0xf0] sm:$0xff] }
   0xb   :  { %975 = vmatprep.subr.bf16.mxu0 %v974_v17  ;;  %v56_v38 = vsel %vm53_vm0, %v54_v30, %v55_v32  ;;  %v256_v39 = vsel %vm253_vm1, %v254_v31, %v255_v33  ;;  %v250_v47 = vld [vmem:[%s1445_s1 + $0x168] sm:$0xff]  ;;  %v926_v48 = vpack.c.bf16 %v45_v45, %v44_v44  ;;  %v47_v51 = vld [vmem:[%s1445_s1 + $0xf8] sm:$0xff]  ;;  %v251_v52 = vld [vmem:[%s1445_s1 + $0x170] sm:$0xff] }
   0xc   :  { %744 = vmatprep.mubr.f32.mxu1 %v56_v38  ;;  %820 = vmatprep.mubr.f32.mxu0 %v256_v39  ;;  %v990_v49 = vpack.c.bf16 %v250_v47, %v249_v46  ;;  %v252_v53 = vld [vmem:[%s1445_s1 + $0x178] sm:$0xff]  ;;  %v930_v54 = vpack.c.bf16 %v47_v51, %v46_v50  ;;  %v1228_v55 = vld [vmem:[%s1446_s0 + $0x10] sm:$0xff]  ;;  %v16_v57 = vld [vmem:[%s1445_s1] sm:$0xff] }
   0xd   :  { %913 = vmatpush3.bf16.msra.mxu1 %v910_v16  ;;  %v994_v56 = vpack.c.bf16 %v252_v53, %v251_v52  ;;  %v17_v58 = vld [vmem:[%s1445_s1 + $0x8] sm:$0xff]  ;;  %v356_v59 = vld [vmem:[%s1445_s1 + $0x180] sm:$0xff]  ;;  %v57_v61 = vrot.slane %v1228_v55, 1  ;;  %v1246_v62 = vld [vmem:[%s1446_s0 + $0x18] sm:$0xff]  ;;  %v257_v0 = vrot.slane %v1228_v55, 2 }
   0xe   :  { %977 = vmatpush3.bf16.msra.mxu0 %v974_v17  ;;  %915 = vmatprep.subr.bf16.mxu1 %v914_v22  ;;  %v357_v60 = vld [vmem:[%s1445_s1 + $0x188] sm:$0xff]  ;;  %v934_v63 = vpack.c.bf16 %v17_v58, %v16_v57  ;;  %v1252_v1 = vld [vmem:[%s1446_s0 + $0x20] sm:$0xff]  ;;  %v18_v3 = vld [vmem:[%s1445_s1 + $0x10] sm:$0xff]  ;;  %v59_v7 = vrot.slane %v1246_v62, 1  ;;  %v259_v9 = vrot.slane %v1246_v62, 2 }
   0xf   :  { %979 = vmatprep.subr.bf16.mxu0 %v978_v23  ;;  %v998_v2 = vpack.c.bf16 %v357_v60, %v356_v59  ;;  %v19_v4 = vld [vmem:[%s1445_s1 + $0x18] sm:$0xff]  ;;  %v358_v5 = vld [vmem:[%s1445_s1 + $0x190] sm:$0xff]  ;;  %v58_v8 = vsel %vm53_vm0, %v55_v32, %v57_v61  ;;  %v61_v10 = vrot.slane %v1252_v1, 1  ;;  %v258_v11 = vsel %vm253_vm1, %v255_v33, %v257_v0  ;;  %v20_v15 = vld [vmem:[%s1445_s1 + $0x20] sm:$0xff] }
  0x10   :  { %v359_v6 = vld [vmem:[%s1445_s1 + $0x198] sm:$0xff]  ;;  %v938_v12 = vpack.c.bf16 %v19_v4, %v18_v3  ;;  %v261_v13 = vrot.slane %v1252_v1, 2  ;;  %v21_v16 = vld [vmem:[%s1445_s1 + $0x28] sm:$0xff]  ;;  %v360_v17 = vld [vmem:[%s1445_s1 + $0x1a0] sm:$0xff]  ;;  %v60_v19 = vsel %vm53_vm0, %v57_v61, %v59_v7  ;;  %v260_v20 = vsel %vm253_vm1, %v257_v0, %v259_v9 }
  0x11   :  { %917 = vmatpush3.bf16.msra.mxu1 %v914_v22  ;;  %v1002_v14 = vpack.c.bf16 %v359_v6, %v358_v5  ;;  %v361_v18 = vld [vmem:[%s1445_s1 + $0x1a8] sm:$0xff]  ;;  %v62_v21 = vsel %vm53_vm0, %v59_v7, %v61_v10  ;;  %v373_v22 = vrot.slane %v1166_v26, 3  ;;  %v942_v24 = vpack.c.bf16 %v21_v16, %v20_v15  ;;  %v22_v28 = vld [vmem:[%s1445_s1 + $0x30] sm:$0xff]  ;;  %v23_v30 = vld [vmem:[%s1445_s1 + $0x38] sm:$0xff] }
  0x12   :  { %981 = vmatpush3.bf16.msra.mxu0 %v978_v23  ;;  %919 = vmatprep.subr.bf16.mxu1 %v918_v34  ;;  %v374_v23 = vrot.slane %v1177_v29, 3  ;;  %v262_v25 = vsel %vm253_vm1, %v259_v9, %v261_v13  ;;  %v1006_v27 = vpack.c.bf16 %v361_v18, %v360_v17  ;;  %v362_v31 = vld [vmem:[%s1445_s1 + $0x1b0] sm:$0xff]  ;;  %v363_v32 = vld [vmem:[%s1445_s1 + $0x1b8] sm:$0xff]  ;;  %v24_v36 = vld [vmem:[%s1445_s1 + $0x40] sm:$0xff]  ;;  %v376_v0 = vrot.slane %v1228_v55, 3 }
  0x13   :  { %983 = vmatprep.subr.bf16.mxu0 %v982_v35  ;;  %v25_v37 = vld [vmem:[%s1445_s1 + $0x48] sm:$0xff]  ;;  %v364_v38 = vld [vmem:[%s1445_s1 + $0x1c0] sm:$0xff]  ;;  %v366_v44 = vld [vmem:[%s1445_s1 + $0x1d0] sm:$0xff]  ;;  %v378_v3 = vrot.slane %v1246_v62, 3  ;;  %v380_v7 = vrot.slane %v1252_v1, 3  ;;  %v493_v13 = vrot.slane %v1177_v29, 4 }
  0x14   :  { %v375_v33 = vsel %vm372_vm2, %v373_v22, %v374_v23  ;;  %v365_v39 = vld [vmem:[%s1445_s1 + $0x1c8] sm:$0xff]  ;;  %v950_v40 = vpack.c.bf16 %v25_v37, %v24_v36  ;;  %v367_v45 = vld [vmem:[%s1445_s1 + $0x1d8] sm:$0xff]  ;;  %v368_v50 = vld [vmem:[%s1445_s1 + $0x1e0] sm:$0xff]  ;;  %v377_v6 = vsel %vm372_vm2, %v374_v23, %v376_v0  ;;  %v497_v15 = vrot.slane %v1246_v62, 4 }
  0x15   :  { %921 = vmatpush3.bf16.msra.mxu1 %v918_v34  ;;  %v946_v34 = vpack.c.bf16 %v23_v30, %v22_v28  ;;  %v1014_v41 = vpack.c.bf16 %v365_v39, %v364_v38  ;;  %v1018_v47 = vpack.c.bf16 %v367_v45, %v366_v44  ;;  %v369_v51 = vld [vmem:[%s1445_s1 + $0x1e8] sm:$0xff]  ;;  %v370_v57 = vld [vmem:[%s1445_s1 + $0x1f0] sm:$0xff]  ;;  %v371_v58 = vld [vmem:[%s1445_s1 + $0x1f8] sm:$0xff]  ;;  %v381_v16 = vsel %vm372_vm2, %v378_v3, %v380_v7 }
  0x16   :  { %985 = vmatpush3.bf16.msra.mxu0 %v982_v35  ;;  %923 = vmatprep.subr.bf16.mxu1 %v922_v42  ;;  %v1010_v35 = vpack.c.bf16 %v363_v32, %v362_v31  ;;  %v1022_v53 = vpack.c.bf16 %v369_v51, %v368_v50  ;;  %v1026_v60 = vpack.c.bf16 %v371_v58, %v370_v57  ;;  %v475_v61 = vld [vmem:[%s1445_s1 + $0x200] sm:$0xff]  ;;  %v477_v4 = vld [vmem:[%s1445_s1 + $0x210] sm:$0xff]  ;;  %v478_v5 = vld [vmem:[%s1445_s1 + $0x218] sm:$0xff] }
  0x17   :  { %987 = vmatprep.subr.bf16.mxu0 %v986_v43  ;;  %v479_v9 = vld [vmem:[%s1445_s1 + $0x220] sm:$0xff]  ;;  %v480_v10 = vld [vmem:[%s1445_s1 + $0x228] sm:$0xff]  ;;  %v482_v18 = vld [vmem:[%s1445_s1 + $0x238] sm:$0xff] }
  0x18   :  { %v1038_v17 = vpack.c.bf16 %v480_v10, %v479_v9  ;;  %v485_v23 = vld [vmem:[%s1445_s1 + $0x250] sm:$0xff]  ;;  %v488_v28 = vld [vmem:[%s1445_s1 + $0x268] sm:$0xff]  ;;  %v490_v32 = vld [vmem:[%s1445_s1 + $0x278] sm:$0xff] }
  0x19   :  { %925 = vmatpush3.bf16.msra.mxu1 %v922_v42  ;;  %v26_v42 = vld [vmem:[%s1445_s1 + $0x50] sm:$0xff]  ;;  %v611_v44 = vld [vmem:[%s1445_s1 + $0x280] ss:$0 sm:$0xff] }
  0x1a   :  { %989 = vmatpush3.bf16.msra.mxu0 %v986_v43  ;;  %927 = vmatprep.subr.bf16.mxu1 %v926_v48  ;;  %v27_v43 = vld [vmem:[%s1445_s1 + $0x58] sm:$0xff]  ;;  %v489_v31 = vld [vmem:[%s1445_s1 + $0x270] sm:$0xff] }
  0x1b   :  { %991 = vmatprep.subr.bf16.mxu0 %v990_v49  ;;  %v954_v46 = vpack.c.bf16 %v27_v43, %v26_v42 }
  0x1d   :  { %929 = vmatpush3.bf16.msra.mxu1 %v926_v48  ;;  %v28_v48 = vld [vmem:[%s1445_s1 + $0x60] sm:$0xff] }
  0x1e   :  { %993 = vmatpush3.bf16.msra.mxu0 %v990_v49  ;;  %931 = vmatprep.subr.bf16.mxu1 %v930_v54  ;;  %v29_v49 = vld [vmem:[%s1445_s1 + $0x68] sm:$0xff] }
  0x1f   :  { %995 = vmatprep.subr.bf16.mxu0 %v994_v56  ;;  %v958_v52 = vpack.c.bf16 %v29_v49, %v28_v48 }
  0x21   :  { %933 = vmatpush3.bf16.msra.mxu1 %v930_v54  ;;  %v30_v54 = vld [vmem:[%s1445_s1 + $0x70] sm:$0xff] }
  0x22   :  { %997 = vmatpush3.bf16.msra.mxu0 %v994_v56  ;;  %935 = vmatprep.subr.bf16.mxu1 %v934_v63  ;;  %v31_v56 = vld [vmem:[%s1445_s1 + $0x78] sm:$0xff] }
  0x23   :  { %999 = vmatprep.subr.bf16.mxu0 %v998_v2  ;;  %v962_v59 = vpack.c.bf16 %v31_v56, %v30_v54 }
  0x24   :  { %745 = vmatmul.mubr.f32.vlgmr.msra.gmra.mrb[0].mxu1 %v58_v8  ;;  %v1034_v8 = vpack.c.bf16 %v478_v5, %v477_v4 }
  0x25   :  { %937 = vmatpush3.bf16.msra.mxu1 %v934_v63  ;;  %821 = vmatmul.mubr.f32.vlgmr.msra.gmra.mrb[0].mxu0 %v258_v11  ;;  %v476_v63 = vld [vmem:[%s1445_s1 + $0x208] sm:$0xff]  ;;  %v379_v11 = vsel %vm372_vm2, %v376_v0, %v378_v3 }
  0x26   :  { %1001 = vmatpush3.bf16.msra.mxu0 %v998_v2  ;;  %939 = vmatprep.subr.bf16.mxu1 %v938_v12  ;;  %v1030_v2 = vpack.c.bf16 %v476_v63, %v475_v61 }
  0x27   :  { %1003 = vmatprep.subr.bf16.mxu0 %v1002_v14  ;;  %747 = vmatprep.mubr.f32.mxu1 %v60_v19 }
  0x28   :  { %823 = vmatprep.mubr.f32.mxu0 %v260_v20  ;;  %748 = vmatmul.mubr.f32.gmra.mrb[2].mxu1 %v62_v21  ;;  %v483_v21 = vld [vmem:[%s1445_s1 + $0x240] sm:$0xff] }
  0x29   :  { %941 = vmatpush3.bf16.msra.mxu1 %v938_v12  ;;  %824 = vmatmul.mubr.f32.gmra.mrb[2].mxu0 %v262_v25  ;;  %v492_v12 = vrot.slane %v1166_v26, 4 }
  0x2a   :  { %1005 = vmatpush3.bf16.msra.mxu0 %v1002_v14  ;;  %943 = vmatprep.subr.bf16.mxu1 %v942_v24  ;;  %v495_v14 = vrot.slane %v1228_v55, 4 }
  0x2b   :  { %1007 = vmatprep.subr.bf16.mxu0 %v1006_v27  ;;  %782 = vmatprep.mubr.f32.mxu1 %v1166_v26  ;;  %v481_v26 = vld [vmem:[%s1445_s1 + $0x230] sm:$0xff] }
  0x2c   :  { %858 = vmatprep.mubr.f32.mxu0 %v375_v33  ;;  %v498_v19 = vsel %vm491_vm3, %v495_v14, %v497_v15  ;;  %v1042_v20 = vpack.c.bf16 %v482_v18, %v481_v26  ;;  %v1058_v33 = vpack.c.bf16 %v490_v32, %v489_v31  ;;  %v496_v36 = vsel %vm491_vm3, %v493_v13, %v495_v14 }
  0x2d   :  { %945 = vmatpush3.bf16.msra.mxu1 %v942_v24  ;;  %v486_v24 = vld [vmem:[%s1445_s1 + $0x258] sm:$0xff] }
  0x2e   :  { %1009 = vmatpush3.bf16.msra.mxu0 %v1006_v27  ;;  %947 = vmatprep.subr.bf16.mxu1 %v946_v34  ;;  %v1050_v25 = vpack.c.bf16 %v486_v24, %v485_v23  ;;  %v487_v27 = vld [vmem:[%s1445_s1 + $0x260] sm:$0xff] }
  0x2f   :  { %1011 = vmatprep.subr.bf16.mxu0 %v1010_v35  ;;  %v1054_v30 = vpack.c.bf16 %v488_v28, %v487_v27 }
  0x31   :  { %949 = vmatpush3.bf16.msra.mxu1 %v946_v34  ;;  %v499_v34 = vrot.slane %v1252_v1, 4 }
  0x32   :  { %1013 = vmatpush3.bf16.msra.mxu0 %v1010_v35  ;;  %951 = vmatprep.subr.bf16.mxu1 %v950_v40 }
  0x33   :  { %1015 = vmatprep.subr.bf16.mxu0 %v1014_v41  ;;  %v500_v35 = vsel %vm491_vm3, %v497_v15, %v499_v34 }
  0x35   :  { %953 = vmatpush3.bf16.msra.mxu1 %v950_v40 }
  0x36   :  { %1017 = vmatpush3.bf16.msra.mxu0 %v1014_v41  ;;  %955 = vmatprep.subr.bf16.mxu1 %v954_v46 }
  0x37   :  { %1019 = vmatprep.subr.bf16.mxu0 %v1018_v47 }
  0x39   :  { %957 = vmatpush3.bf16.msra.mxu1 %v954_v46 }
  0x3a   :  { %1021 = vmatpush3.bf16.msra.mxu0 %v1018_v47  ;;  %959 = vmatprep.subr.bf16.mxu1 %v958_v52 }
  0x3b   :  { %1023 = vmatprep.subr.bf16.mxu0 %v1022_v53 }
  0x3d   :  { %961 = vmatpush3.bf16.msra.mxu1 %v958_v52 }
  0x3e   :  { %1025 = vmatpush3.bf16.msra.mxu0 %v1022_v53  ;;  %963 = vmatprep.subr.bf16.mxu1 %v962_v59 }
  0x3f   :  { %1027 = vmatprep.subr.bf16.mxu0 %v1026_v60 }
  0x41   :  { %965 = vmatpush3.bf16.msra.mxu1 %v962_v59 }
  0x42   :  { %1029 = vmatpush3.bf16.msra.mxu0 %v1026_v60  ;;  %1062 = vmatprep.subr.bf16.mxu1 %v1030_v2 }
  0x43   :  { %1031 = vmatprep.subr.bf16.mxu0 %v1030_v2 }
  0x44   :  { %783 = vmatmul.mubr.f32.vlgmr.msra.gmra.mrb[0].mxu1 %v1177_v29 }
  0x45   :  { %859 = vmatmul.mubr.f32.vlgmr.msra.gmra.mrb[0].mxu0 %v377_v6  ;;  %1070 = vmatpush3.bf16.msra.mxu1 %v1030_v2 }
  0x46   :  { %1033 = vmatpush3.bf16.msra.mxu0 %v1030_v2  ;;  %785 = vmatprep.mubr.f32.mxu1 %v1228_v55  ;;  %v494_v55 = vsel %vm491_vm3, %v492_v12, %v493_v13 }
  0x47   :  { %861 = vmatprep.mubr.f32.mxu0 %v379_v11  ;;  %1035 = vmatprep.subr.bf16.mxu0 %v1034_v8 }
  0x48   :  { %786 = vmatmul.mubr.f32.gmra.mrb[2].mxu1 %v1246_v62  ;;  %1063 = vmatprep.subr.bf16.mxu1 %v1034_v8  ;;  %v484_v62 = vld [vmem:[%s1445_s1 + $0x248] sm:$0xff] }
  0x49   :  { %862 = vmatmul.mubr.f32.gmra.mrb[2].mxu0 %v381_v16  ;;  %1071 = vmatpush3.bf16.msra.mxu1 %v1034_v8  ;;  %v1046_v22 = vpack.c.bf16 %v484_v62, %v483_v21 }
  0x4a   :  { %1037 = vmatpush3.bf16.msra.mxu0 %v1034_v8  ;;  %1064 = vmatprep.subr.bf16.mxu1 %v1038_v17 }
  0x4b   :  { %1039 = vmatprep.subr.bf16.mxu0 %v1038_v17  ;;  %896 = vmatprep.mubr.f32.mxu0 %v494_v55 }
  0x4c   :  { %899 = vmatprep.mubr.f32.mxu1 %v498_v19 }
  0x4d   :  { %1072 = vmatpush3.bf16.msra.mxu1 %v1038_v17 }
  0x4e   :  { %1041 = vmatpush3.bf16.msra.mxu0 %v1038_v17  ;;  %1065 = vmatprep.subr.bf16.mxu1 %v1042_v20 }
  0x4f   :  { %1043 = vmatprep.subr.bf16.mxu0 %v1042_v20 }
  0x51   :  { %1073 = vmatpush3.bf16.msra.mxu1 %v1042_v20 }
  0x52   :  { %1045 = vmatpush3.bf16.msra.mxu0 %v1042_v20  ;;  %1066 = vmatprep.subr.bf16.mxu1 %v1046_v22 }
  0x53   :  { %1047 = vmatprep.subr.bf16.mxu0 %v1046_v22 }
  0x55   :  { %1074 = vmatpush3.bf16.msra.mxu1 %v1046_v22 }
  0x56   :  { %1049 = vmatpush3.bf16.msra.mxu0 %v1046_v22  ;;  %1067 = vmatprep.subr.bf16.mxu1 %v1050_v25 }
  0x57   :  { %1051 = vmatprep.subr.bf16.mxu0 %v1050_v25 }
  0x59   :  { %1075 = vmatpush3.bf16.msra.mxu1 %v1050_v25 }
  0x5a   :  { %1053 = vmatpush3.bf16.msra.mxu0 %v1050_v25  ;;  %1068 = vmatprep.subr.bf16.mxu1 %v1054_v30 }
  0x5b   :  { %1055 = vmatprep.subr.bf16.mxu0 %v1054_v30 }
  0x5d   :  { %1076 = vmatpush3.bf16.msra.mxu1 %v1054_v30 }
  0x5e   :  { %1057 = vmatpush3.bf16.msra.mxu0 %v1054_v30  ;;  %1069 = vmatprep.subr.bf16.mxu1 %v1058_v33 }
  0x5f   :  { %1059 = vmatprep.subr.bf16.mxu0 %v1058_v33 }
  0x61   :  { %1077 = vmatpush3.bf16.msra.mxu1 %v1058_v33 }
  0x62   :  { %1061 = vmatpush3.bf16.msra.mxu0 %v1058_v33 }
  0x64   :  { %900 = vmatmul.mubr.f32.vlgmr.msra.gmra.mrb[4].mxu1 %v500_v35 }
  0x65   :  { %897 = vmatmul.mubr.f32.vlgmr.msra.gmra.mrb[0].mxu0 %v496_v36 }
 0x117   :  { %v784_v37 = vpop.f32.mrb[0].mxu1 }
 0x118   :  { %v218_v38 = vpop.f32.mrb[1].mxu1 }
 0x11b   :  { %v787_v39 = vpop.f32.mrb[2].mxu1 }
 0x11c   :  { %v863_v40 = vpop.f32.mrb[2].mxu0  ;;  %v228_v41 = vpop.f32.mrb[3].mxu1 }
 0x11d   :  { %v1080_v42 = vadd.f32 %v863_v40, %v787_v39  ;;  %v462_v1 = vpop.f32.mrb[3].mxu0 }
 0x11e   :  { %v1082_v43 = vadd.f32 %v462_v1, %v228_v41 }
 0x137   :  { %v901_v45 = vpop.f32.mrb[4].mxu1 }
 0x138   :  { %v898_v46 = vpop.f32.mrb[0].mxu0  ;;  %v1081_v47 = vadd.f32 %v1080_v42, %v901_v45  ;;  %v581_v29 = vpop.f32.mrb[5].mxu1 }
 0x139   :  { %v1078_v48 = vadd.f32 %v898_v46, %v784_v37  ;;  %v571_v49 = vpop.f32.mrb[1].mxu0  ;;  %v1083_v50 = vadd.f32 %v1082_v43, %v581_v29 }
 0x13a   :  { %v602_v51 = vadd.f32 %v1081_v47, %v611_v44  ;;  %v1079_v52 = vadd.f32 %v571_v49, %v218_v38 }
 0x13b   :  { %v600_v53 = vadd.f32 %v1078_v48, %v611_v44  ;;  %v601_v54 = vadd.f32 %v1083_v50, %v611_v44 }
 0x13c   :  { %606 = vst [vmem:[%s1447_s2 + $0x18] sm:$0xff] %v602_v51  ;;  %v599_v56 = vadd.f32 %v1079_v52, %v611_v44 }
 0x13d   :  { %604 = vst [vmem:[%s1447_s2 + $0x8] sm:$0xff] %v600_v53  ;;  %605 = vst [vmem:[%s1447_s2 + $0x10] sm:$0xff] %v601_v54 }
 0x13e   :  { %603 = vst [vmem:[%s1447_s2] sm:$0xff] %v599_v56 }

</bundles_post_ra>
